<compile_context>
chip_gen: v7x
topology: tpu7x:2x2x1
jax: 0.10.0
libtpu: 0.0.40
codegen_flags: <defaults>
</compile_context>

<pallas_src>
import functools
import math

import jax
import jax.numpy as jnp
from jax.experimental import pallas as pl
from jax.experimental.pallas import tpu as pltpu


# ---------------------------------------------------------------------------
# Padding / tiling helpers
# ---------------------------------------------------------------------------

def _round_up(x, m):
    return ((x + m - 1) // m) * m


def _tile(dim, pref, align):
    """Return (padded_dim, tile) with tile | padded_dim, tile aligned to `align`."""
    if dim >= pref:
        return _round_up(dim, pref), pref
    p = _round_up(dim, align)
    return p, p


def _pad2(a, rows, cols):
    r, c = a.shape
    if r == rows and c == cols:
        return a
    return jnp.pad(a, ((0, rows - r), (0, cols - c)))


def _pad1(a, n):
    if a.shape[0] == n:
        return a
    return jnp.pad(a, (0, n - a.shape[0]))


# ---------------------------------------------------------------------------
# Kernel 1: tiled linear (+ bias, + optional ReLU)
# ---------------------------------------------------------------------------

def _linear_kernel(*refs, activation, has_bias):
    if has_bias:
        x_ref, w_ref, b_ref, o_ref, acc_ref = refs
    else:
        x_ref, w_ref, o_ref, acc_ref = refs
        b_ref = None

    @pl.when(pl.program_id(2) == 0)
    def _():
        acc_ref[...] = jnp.zeros_like(acc_ref)

    acc_ref[...] += jnp.dot(x_ref[...].astype(jnp.bfloat16), w_ref[...],
                            preferred_element_type=jnp.float32)

    @pl.when(pl.program_id(2) == pl.num_programs(2) - 1)
    def _():
        y = acc_ref[...]
        if has_bias:
            y = y + b_ref[...]
        if activation == "relu":
            y = jnp.maximum(y, 0.0)
        o_ref[...] = y


def pallas_linear(x, w, b=None, activation=None):
    """y = x @ w (+ b) (+ ReLU). x:(M,K) f32, w:(K,N) f32 (cast to bf16), b:(N,) or None."""
    M, K = x.shape
    N = w.shape[1]
    Mp, tm = _tile(M, 128, 8)
    Kp, tk = _tile(K, 512, 128)
    Np, tn = _tile(N, 256, 128)

    xp = _pad2(x, Mp, Kp)
    wp = _pad2(w, Kp, Np).astype(jnp.bfloat16)

    in_arrays = [xp, wp]
    in_specs = [
        pl.BlockSpec((tm, tk), lambda i, j, k: (i, k)),
        pl.BlockSpec((tk, tn), lambda i, j, k: (k, j)),
    ]
    has_bias = b is not None
    if has_bias:
        in_arrays.append(_pad1(b, Np).reshape(1, Np))
        in_specs.append(pl.BlockSpec((1, tn), lambda i, j, k: (0, j)))

    out = pl.pallas_call(
        functools.partial(_linear_kernel, activation=activation, has_bias=has_bias),
        out_shape=jax.ShapeDtypeStruct((Mp, Np), jnp.float32),
        grid=(Mp // tm, Np // tn, Kp // tk),
        in_specs=in_specs,
        out_specs=pl.BlockSpec((tm, tn), lambda i, j, k: (i, j)),
        scratch_shapes=[pltpu.VMEM((tm, tn), jnp.float32)],
        compiler_params=pltpu.CompilerParams(
            dimension_semantics=("parallel", "parallel", "arbitrary")),
    )(*in_arrays)
    return out[:M, :N]


# ---------------------------------------------------------------------------
# Kernel 2: tiled linear + bias (+ residual) + LayerNorm fused epilogue
# (output feature dim resides in a single lane-padded tile)
# ---------------------------------------------------------------------------

def _linear_ln_kernel(*refs, has_residual, d_real):
    if has_residual:
        x_ref, w_ref, b_ref, r_ref, g_ref, bt_ref, o_ref, acc_ref = refs
    else:
        x_ref, w_ref, b_ref, g_ref, bt_ref, o_ref, acc_ref = refs
        r_ref = None

    @pl.when(pl.program_id(1) == 0)
    def _():
        acc_ref[...] = jnp.zeros_like(acc_ref)

    acc_ref[...] += jnp.dot(x_ref[...].astype(jnp.bfloat16), w_ref[...],
                            preferred_element_type=jnp.float32)

    @pl.when(pl.program_id(1) == pl.num_programs(1) - 1)
    def _():
        y = acc_ref[...] + b_ref[...]
        if has_residual:
            y = y + r_ref[...]
        # Padded lanes of y are exactly zero (zero-padded weights/bias/residual), so
        # full-lane sums divided by the real feature count give the correct moments.
        inv_d = 1.0 / d_real
        mu = jnp.sum(y, axis=-1, keepdims=True) * inv_d
        ex2 = jnp.sum(y * y, axis=-1, keepdims=True) * inv_d
        var = jnp.maximum(ex2 - mu * mu, 0.0)
        o_ref[...] = (y - mu) * jax.lax.rsqrt(var + 1e-5) * g_ref[...] + bt_ref[...]


def pallas_linear_ln(x, w, b, gamma, beta, residual=None):
    """LayerNorm( x @ w + b (+ residual) ) over the last dim, fused in one kernel."""
    M, K = x.shape
    N = w.shape[1]
    Mp, tm = _tile(M, 128, 8)
    Kp, tk = _tile(K, 512, 128)
    Np = _round_up(N, 128)  # full output row per tile (needed for the LN reduction)

    xp = _pad2(x, Mp, Kp)
    wp = _pad2(w, Kp, Np).astype(jnp.bfloat16)
    bp = _pad1(b, Np).reshape(1, Np)
    gp = _pad1(gamma, Np).reshape(1, Np)
    btp = _pad1(beta, Np).reshape(1, Np)

    in_arrays = [xp, wp, bp]
    in_specs = [
        pl.BlockSpec((tm, tk), lambda i, k: (i, k)),
        pl.BlockSpec((tk, Np), lambda i, k: (k, 0)),
        pl.BlockSpec((1, Np), lambda i, k: (0, 0)),
    ]
    has_res = residual is not None
    if has_res:
        in_arrays.append(_pad2(residual, Mp, Np))
        in_specs.append(pl.BlockSpec((tm, Np), lambda i, k: (i, 0)))
    in_arrays += [gp, btp]
    in_specs += [pl.BlockSpec((1, Np), lambda i, k: (0, 0)),
                 pl.BlockSpec((1, Np), lambda i, k: (0, 0))]

    out = pl.pallas_call(
        functools.partial(_linear_ln_kernel, has_residual=has_res, d_real=N),
        out_shape=jax.ShapeDtypeStruct((Mp, Np), jnp.float32),
        grid=(Mp // tm, Kp // tk),
        in_specs=in_specs,
        out_specs=pl.BlockSpec((tm, Np), lambda i, k: (i, 0)),
        scratch_shapes=[pltpu.VMEM((tm, Np), jnp.float32)],
        compiler_params=pltpu.CompilerParams(
            dimension_semantics=("parallel", "arbitrary")),
    )(*in_arrays)
    return out[:M, :N]


# ---------------------------------------------------------------------------
# Kernel 3: scaled-dot-product attention (all heads per batch element)
# ---------------------------------------------------------------------------

def _attn_kernel(q_ref, k_ref, v_ref, m_ref, o_ref, *, n_head, d_k, d_v, scale):
    q = (q_ref[0] * scale).astype(jnp.bfloat16)   # (Lq, H*dk)   scale on q (cheaper than on s)
    k = k_ref[0].astype(jnp.bfloat16)             # (Lk, H*dk)
    v = v_ref[0].astype(jnp.bfloat16)             # (Lk, H*dv)
    mask = m_ref[0] > 0.0                         # (Lq, Lk), shared by all heads

    outs = []
    for h in range(n_head):                       # static unroll over heads
        qh = q[:, h * d_k:(h + 1) * d_k]
        kh = k[:, h * d_k:(h + 1) * d_k]
        vh = v[:, h * d_v:(h + 1) * d_v]
        s = jnp.dot(qh, kh.T, preferred_element_type=jnp.float32)
        s = jnp.where(mask, -1e9, s)
        s = s - jnp.max(s, axis=-1, keepdims=True)
        p = jnp.exp(s)
        denom = jnp.sum(p, axis=-1, keepdims=True)
        p = p * pl.reciprocal(denom, approx=True)
        outs.append(jnp.dot(p.astype(jnp.bfloat16), vh,
                            preferred_element_type=jnp.float32))
    o_ref[0] = jnp.concatenate(outs, axis=-1)


def pallas_attention(q, k, v, mask, n_head, d_k, d_v):
    """q:(N,Lq,H*dk) k:(N,Lk,H*dk) v:(N,Lk,H*dv) mask:(N,Lq,Lk) float (1.0 = masked)."""
    N, Lq, _ = q.shape
    Lk = k.shape[1]
    return pl.pallas_call(
        functools.partial(_attn_kernel, n_head=n_head, d_k=d_k, d_v=d_v,
                          scale=1.0 / math.sqrt(d_k)),
        out_shape=jax.ShapeDtypeStruct((N, Lq, n_head * d_v), jnp.float32),
        grid=(N,),
        in_specs=[
            pl.BlockSpec((1, Lq, n_head * d_k), lambda n: (n, 0, 0)),
            pl.BlockSpec((1, Lk, n_head * d_k), lambda n: (n, 0, 0)),
            pl.BlockSpec((1, Lk, n_head * d_v), lambda n: (n, 0, 0)),
            pl.BlockSpec((1, Lq, Lk), lambda n: (n, 0, 0)),
        ],
        out_specs=pl.BlockSpec((1, Lq, n_head * d_v), lambda n: (n, 0, 0)),
        compiler_params=pltpu.CompilerParams(dimension_semantics=("parallel",)),
    )(q, k, v, mask)
    # TODO(synk): for long sequences this should become a flash-style (Lq-block, Lk-block)
    # online-softmax kernel; whole-row scores are fine at these sizes.


# ---------------------------------------------------------------------------
# Model building blocks (glue around the kernels)
# ---------------------------------------------------------------------------

def multi_head_attention(p, q_in, k_in, v_in, mask, n_head, d_k, d_v, self_attn):
    """Speech-transformer MultiHeadAttention (post-norm, residual inside)."""
    N, Lq, dm = q_in.shape
    Lk = k_in.shape[1]
    qdim = n_head * d_k
    vdim = n_head * d_v
    q_flat = q_in.reshape(-1, dm)

    if self_attn:
        # fused QKV projection: activation read once, lane-dense output
        w = jnp.concatenate([p["wq"], p["wk"], p["wv"]], axis=1)
        bias = jnp.concatenate([p["bq"], p["bk"], p["bv"]])
        qkv = pallas_linear(q_flat, w, bias)
        q3 = qkv[:, :qdim].reshape(N, Lq, qdim)
        k3 = qkv[:, qdim:2 * qdim].reshape(N, Lk, qdim)
        v3 = qkv[:, 2 * qdim:].reshape(N, Lk, vdim)
    else:
        q3 = pallas_linear(q_flat, p["wq"], p["bq"]).reshape(N, Lq, qdim)
        kv_w = jnp.concatenate([p["wk"], p["wv"]], axis=1)
        kv_b = jnp.concatenate([p["bk"], p["bv"]])
        kv = pallas_linear(k_in.reshape(-1, dm), kv_w, kv_b)
        k3 = kv[:, :qdim].reshape(N, Lk, qdim)
        v3 = kv[:, qdim:].reshape(N, Lk, vdim)

    attn = pallas_attention(q3, k3, v3, mask, n_head, d_k, d_v)      # (N, Lq, H*dv)
    # fused: output projection + residual + LayerNorm
    y = pallas_linear_ln(attn.reshape(-1, vdim), p["fc_w"], p["fc_b"],
                         p["ln_g"], p["ln_b"], residual=q_flat)
    return y.reshape(N, Lq, dm)


def positionwise_ffn(p, x):
    N, L, dm = x.shape
    x_flat = x.reshape(-1, dm)
    h = pallas_linear(x_flat, p["w1"], p["b1"], activation="relu")
    y = pallas_linear_ln(h, p["w2"], p["b2"], p["ln_g"], p["ln_b"], residual=x_flat)
    return y.reshape(N, L, dm)


def positional_encoding(max_len, d_model):
    pos = jnp.arange(max_len, dtype=jnp.float32)[:, None]
    div = jnp.exp(jnp.arange(0, d_model, 2, dtype=jnp.float32) * -(math.log(10000.0) / d_model))
    pe = jnp.zeros((max_len, d_model), jnp.float32)
    pe = pe.at[:, 0::2].set(jnp.sin(pos * div))
    pe = pe.at[:, 1::2].set(jnp.cos(pos * div))
    return pe


def encoder_forward(params, padded_input, input_lengths, cfg):
    N, Ti, d_in = padded_input.shape
    dm = cfg["d_model"]

    valid = jnp.arange(Ti)[None, :] < input_lengths[:, None]            # (N, Ti) bool
    non_pad_mask = valid.astype(jnp.float32)[..., None]                 # (N, Ti, 1)
    slf_attn_mask = jnp.broadcast_to((~valid)[:, None, :], (N, Ti, Ti)).astype(jnp.float32)

    # fused input linear + LayerNorm
    x = pallas_linear_ln(padded_input.reshape(-1, d_in),
                         params["lin_w"], params["lin_b"],
                         params["ln_in_g"], params["ln_in_b"], residual=None)
    enc = x.reshape(N, Ti, dm) + params["pe"][:Ti][None, :, :]

    for lp in params["layers"]:
        enc = multi_head_attention(lp["slf_attn"], enc, enc, enc, slf_attn_mask,
                                   cfg["n_head"], cfg["d_k"], cfg["d_v"], self_attn=True)
        enc = enc * non_pad_mask
        enc = positionwise_ffn(lp["ffn"], enc)
        enc = enc * non_pad_mask
    return enc


def decoder_forward(params, padded_target, enc_out, input_lengths, cfg):
    N, To = padded_target.shape
    Ti = enc_out.shape[1]
    dm = cfg["d_model"]
    sos, eos = cfg["sos_id"], cfg["eos_id"]

    # preprocess: ys_in = <sos> + ys ; ys_out = ys + <eos>
    sos_col = jnp.full((N, 1), sos, dtype=padded_target.dtype)
    eos_col = jnp.full((N, 1), eos, dtype=padded_target.dtype)
    ys_in = jnp.concatenate([sos_col, padded_target], axis=1)   # (N, To+1)
    ys_out = jnp.concatenate([padded_target, eos_col], axis=1)  # (N, To+1)
    L = ys_in.shape[1]

    non_pad_mask = (ys_in != eos).astype(jnp.float32)[..., None]                   # (N, L, 1)
    subseq = jnp.triu(jnp.ones((L, L), jnp.float32), k=1)[None]                    # (1, L, L)
    keypad = (ys_in == eos).astype(jnp.float32)[:, None, :]                        # (N, 1, L)
    slf_attn_mask = ((keypad + subseq) > 0).astype(jnp.float32)                    # (N, L, L)
    enc_valid = jnp.arange(Ti)[None, :] < input_lengths[:, None]                   # (N, Ti)
    dec_enc_attn_mask = jnp.broadcast_to((~enc_valid)[:, None, :], (N, L, Ti)).astype(jnp.float32)

    # embedding gather kept in JAX glue; x_logit_scale = 1 (no weight sharing)
    dec = params["emb"][ys_in] + params["pe"][:L][None, :, :]

    for lp in params["layers"]:
        dec = multi_head_attention(lp["slf_attn"], dec, dec, dec, slf_attn_mask,
                                   cfg["n_head"], cfg["d_k"], cfg["d_v"], self_attn=True)
        dec = dec * non_pad_mask
        dec = multi_head_attention(lp["enc_attn"], dec, enc_out, enc_out, dec_enc_attn_mask,
                                   cfg["n_head"], cfg["d_k"], cfg["d_v"], self_attn=False)
        dec = dec * non_pad_mask
        dec = positionwise_ffn(lp["ffn"], dec)
        dec = dec * non_pad_mask

    vocab = params["prj_w"].shape[1]
    pred = pallas_linear(dec.reshape(-1, dm), params["prj_w"], b=None).reshape(N, L, vocab)
    return pred, ys_out


def transformer_forward(params, padded_input, input_lengths, padded_target, cfg):
    enc_out = encoder_forward(params["encoder"], padded_input, input_lengths, cfg)
    pred, gold = decoder_forward(params["decoder"], padded_target, enc_out, input_lengths, cfg)
    return pred, gold


# ---------------------------------------------------------------------------
# Deterministic parameter initialization (xavier-uniform for dim>1, zeros for bias)
# ---------------------------------------------------------------------------

def xavier(key, shape):
    bound = math.sqrt(6.0 / (shape[0] + shape[1]))
    return jax.random.uniform(key, shape, jnp.float32, -bound, bound)


def init_mha(key, d_model, n_head, d_k, d_v):
    ks = jax.random.split(key, 4)
    return {
        "wq": xavier(ks[0], (d_model, n_head * d_k)), "bq": jnp.zeros((n_head * d_k,), jnp.float32),
        "wk": xavier(ks[1], (d_model, n_head * d_k)), "bk": jnp.zeros((n_head * d_k,), jnp.float32),
        "wv": xavier(ks[2], (d_model, n_head * d_v)), "bv": jnp.zeros((n_head * d_v,), jnp.float32),
        "fc_w": xavier(ks[3], (n_head * d_v, d_model)), "fc_b": jnp.zeros((d_model,), jnp.float32),
        "ln_g": jnp.ones((d_model,), jnp.float32), "ln_b": jnp.zeros((d_model,), jnp.float32),
    }


def init_ffn(key, d_model, d_inner):
    ks = jax.random.split(key, 2)
    return {
        "w1": xavier(ks[0], (d_model, d_inner)), "b1": jnp.zeros((d_inner,), jnp.float32),
        "w2": xavier(ks[1], (d_inner, d_model)), "b2": jnp.zeros((d_model,), jnp.float32),
        "ln_g": jnp.ones((d_model,), jnp.float32), "ln_b": jnp.zeros((d_model,), jnp.float32),
    }


def init_params(key, cfg):
    dm, dinner = cfg["d_model"], cfg["d_inner"]
    k_enc, k_dec = jax.random.split(key)

    # encoder
    ks = jax.random.split(k_enc, 1 + 2 * cfg["n_layers_enc"])
    enc_layers = []
    for i in range(cfg["n_layers_enc"]):
        enc_layers.append({
            "slf_attn": init_mha(ks[1 + 2 * i], dm, cfg["n_head"], cfg["d_k"], cfg["d_v"]),
            "ffn": init_ffn(ks[2 + 2 * i], dm, dinner),
        })
    encoder = {
        "lin_w": xavier(ks[0], (cfg["d_input"], dm)),
        "lin_b": jnp.zeros((dm,), jnp.float32),
        "ln_in_g": jnp.ones((dm,), jnp.float32),
        "ln_in_b": jnp.zeros((dm,), jnp.float32),
        "pe": positional_encoding(cfg["pe_maxlen"], dm),
        "layers": enc_layers,
    }

    # decoder
    ks = jax.random.split(k_dec, 2 + 3 * cfg["n_layers_dec"])
    dec_layers = []
    for i in range(cfg["n_layers_dec"]):
        dec_layers.append({
            "slf_attn": init_mha(ks[2 + 3 * i], dm, cfg["n_head"], cfg["d_k"], cfg["d_v"]),
            "enc_attn": init_mha(ks[3 + 3 * i], dm, cfg["n_head"], cfg["d_k"], cfg["d_v"]),
            "ffn": init_ffn(ks[4 + 3 * i], dm, dinner),
        })
    decoder = {
        "emb": xavier(ks[0], (cfg["vocab_size"], dm)),
        "prj_w": xavier(ks[1], (dm, cfg["vocab_size"])),
        "pe": positional_encoding(cfg["pe_maxlen"], dm),
        "layers": dec_layers,
    }
    return {"encoder": encoder, "decoder": decoder}


# ---------------------------------------------------------------------------
# Main
# ---------------------------------------------------------------------------

if __name__ == "__main__":
    cfg = dict(
        d_input=8, d_model=32, d_inner=64, n_head=2, d_k=16, d_v=16,
        n_layers_enc=1, n_layers_dec=1, vocab_size=40,
        sos_id=38, eos_id=39, pe_maxlen=64,
    )

    key = jax.random.PRNGKey(0)
    k_param, k_in, k_tgt = jax.random.split(key, 3)

    params = init_params(k_param, cfg)

    N, Ti, To = 2, 16, 7
    padded_input = jax.random.normal(k_in, (N, Ti, cfg["d_input"]), jnp.float32)
    input_lengths = jnp.array([16, 12], dtype=jnp.int32)
    padded_target = jax.random.randint(k_tgt, (N, To), 3, cfg["sos_id"], dtype=jnp.int32)

    pred, gold = transformer_forward(params, padded_input, input_lengths, padded_target, cfg)
    pred = jax.block_until_ready(pred)
    gold = jax.block_until_ready(gold)

    assert pred.shape == (N, To + 1, cfg["vocab_size"])
    assert gold.shape == (N, To + 1)
    assert bool(jnp.all(jnp.isfinite(pred)))

    # TODO(synk): recognize() beam search (sequential, data-dependent decoding) is not
    # implemented as a Pallas kernel; only the training forward pass is covered.
    print("KERNEL_OK")
</pallas_src>

<mosaic_0001>
module attributes {stable_mosaic.version = 11 : i64} {
  func.func @_linear_ln_kernel(%arg0: i32, %arg1: i32, %arg2: memref<32x128xf32, #tpu.memory_space<vmem>>, %arg3: memref<128x128xbf16, #tpu.memory_space<vmem>>, %arg4: memref<1x128xf32, #tpu.memory_space<vmem>>, %arg5: memref<1x128xf32, #tpu.memory_space<vmem>>, %arg6: memref<1x128xf32, #tpu.memory_space<vmem>>, %arg7: memref<32x128xf32, #tpu.memory_space<vmem>>, %arg8: memref<32x128xf32, #tpu.memory_space<vmem>>) attributes {dimension_semantics = [#tpu.dimension_semantics<parallel>, #tpu.dimension_semantics<arbitrary>], iteration_bounds = array<i64: 1, 1>, scalar_prefetch = 0 : i64, scratch_operands = 1 : i64, tpu.core_type = #tpu.core_type<tc>, window_params = [{transform_indices = @transform_0, window_bounds = array<i64: 32, 128>}, {transform_indices = @transform_1, window_bounds = array<i64: 128, 128>}, {pipeline_mode = #tpu.pipeline_mode<synchronous>, transform_indices = @transform_2, window_bounds = array<i64: 1, 128>}, {pipeline_mode = #tpu.pipeline_mode<synchronous>, transform_indices = @transform_3, window_bounds = array<i64: 1, 128>}, {pipeline_mode = #tpu.pipeline_mode<synchronous>, transform_indices = @transform_4, window_bounds = array<i64: 1, 128>}, {transform_indices = @transform_5, window_bounds = array<i64: 32, 128>}]} {
    %c0_i32 = arith.constant 0 : i32
    %0 = arith.cmpi eq, %arg1, %c0_i32 : i32
    %1 = arith.extui %0 : i1 to i32
    %c0_i32_0 = arith.constant 0 : i32
    %2 = arith.cmpi ne, %1, %c0_i32_0 : i32
    scf.if %2 {
      %cst_10 = arith.constant 0.000000e+00 : f32
      %13 = vector.broadcast %cst_10 : f32 to vector<32x128xf32>
      %c0_11 = arith.constant 0 : index
      %c0_12 = arith.constant 0 : index
      %14 = vector.load %arg8[%c0_11, %c0_12] : memref<32x128xf32, #tpu.memory_space<vmem>>, vector<32x128xf32>
      tpu.vector_store %arg8[%c0_11, %c0_12], %13 {strides = array<i32>} : memref<32x128xf32, #tpu.memory_space<vmem>>, vector<32x128xf32>,
    } else {
    }
    %c0 = arith.constant 0 : index
    %c0_1 = arith.constant 0 : index
    %3 = vector.load %arg8[%c0, %c0_1] : memref<32x128xf32, #tpu.memory_space<vmem>>, vector<32x128xf32>
    %c0_2 = arith.constant 0 : index
    %c0_3 = arith.constant 0 : index
    %4 = vector.load %arg2[%c0_2, %c0_3] : memref<32x128xf32, #tpu.memory_space<vmem>>, vector<32x128xf32>
    %5 = arith.truncf %4 : vector<32x128xf32> to vector<32x128xbf16>
    %c0_4 = arith.constant 0 : index
    %c0_5 = arith.constant 0 : index
    %6 = vector.load %arg3[%c0_4, %c0_5] : memref<128x128xbf16, #tpu.memory_space<vmem>>, vector<128x128xbf16>
    %cst = arith.constant dense<0.000000e+00> : vector<32x128xf32>
    %7 = tpu.matmul %5, %6, %cst {dimension_numbers = #tpu.dot_dimension_numbers<[1], [0], [0], [1], [0, 0, 1, 1], [], []>} : vector<32x128xbf16>, vector<128x128xbf16>, vector<32x128xf32> -> vector<32x128xf32>
    %8 = arith.addf %3, %7 : vector<32x128xf32>
    %c0_6 = arith.constant 0 : index
    %c0_7 = arith.constant 0 : index
    %9 = vector.load %arg8[%c0_6, %c0_7] : memref<32x128xf32, #tpu.memory_space<vmem>>, vector<32x128xf32>
    tpu.vector_store %arg8[%c0_6, %c0_7], %8 {strides = array<i32>} : memref<32x128xf32, #tpu.memory_space<vmem>>, vector<32x128xf32>,
    %c0_i32_8 = arith.constant 0 : i32
    %10 = arith.cmpi eq, %arg1, %c0_i32_8 : i32
    %11 = arith.extui %10 : i1 to i32
    %c0_i32_9 = arith.constant 0 : i32
    %12 = arith.cmpi ne, %11, %c0_i32_9 : i32
    scf.if %12 {
      %c0_10 = arith.constant 0 : index
      %c0_11 = arith.constant 0 : index
      %13 = vector.load %arg8[%c0_10, %c0_11] : memref<32x128xf32, #tpu.memory_space<vmem>>, vector<32x128xf32>
      %c0_12 = arith.constant 0 : index
      %c0_13 = arith.constant 0 : index
      %14 = vector.load %arg4[%c0_12, %c0_13] : memref<1x128xf32, #tpu.memory_space<vmem>>, vector<1x128xf32>
      %15 = vector.broadcast %14 : vector<1x128xf32> to vector<32x128xf32>
      %16 = arith.addf %13, %15 : vector<32x128xf32>
      %cst_14 = arith.constant dense<0.000000e+00> : vector<32xf32>
      %17 = vector.multi_reduction <add>, %16, %cst_14 [1] : vector<32x128xf32> to vector<32xf32>
      %18 = vector.shape_cast %17 : vector<32xf32> to vector<32x1xf32>
      %cst_15 = arith.constant 3.125000e-02 : f32
      %19 = vector.broadcast %cst_15 : f32 to vector<32x1xf32>
      %20 = arith.mulf %18, %19 : vector<32x1xf32>
      %21 = arith.mulf %16, %16 : vector<32x128xf32>
      %cst_16 = arith.constant dense<0.000000e+00> : vector<32xf32>
      %22 = vector.multi_reduction <add>, %21, %cst_16 [1] : vector<32x128xf32> to vector<32xf32>
      %23 = vector.shape_cast %22 : vector<32xf32> to vector<32x1xf32>
      %cst_17 = arith.constant 3.125000e-02 : f32
      %24 = vector.broadcast %cst_17 : f32 to vector<32x1xf32>
      %25 = arith.mulf %23, %24 : vector<32x1xf32>
      %26 = arith.mulf %20, %20 : vector<32x1xf32>
      %27 = arith.subf %25, %26 : vector<32x1xf32>
      %cst_18 = arith.constant 0.000000e+00 : f32
      %28 = vector.broadcast %cst_18 : f32 to vector<32x1xf32>
      %29 = arith.maximumf %27, %28 : vector<32x1xf32>
      %30 = vector.broadcast %20 : vector<32x1xf32> to vector<32x128xf32>
      %31 = arith.subf %16, %30 : vector<32x128xf32>
      %cst_19 = arith.constant 9.99999974E-6 : f32
      %32 = vector.broadcast %cst_19 : f32 to vector<32x1xf32>
      %33 = arith.addf %29, %32 : vector<32x1xf32>
      %34 = math.rsqrt %33 : vector<32x1xf32>
      %35 = vector.broadcast %34 : vector<32x1xf32> to vector<32x128xf32>
      %36 = arith.mulf %31, %35 : vector<32x128xf32>
      %c0_20 = arith.constant 0 : index
      %c0_21 = arith.constant 0 : index
      %37 = vector.load %arg5[%c0_20, %c0_21] : memref<1x128xf32, #tpu.memory_space<vmem>>, vector<1x128xf32>
      %38 = vector.broadcast %37 : vector<1x128xf32> to vector<32x128xf32>
      %39 = arith.mulf %36, %38 : vector<32x128xf32>
      %c0_22 = arith.constant 0 : index
      %c0_23 = arith.constant 0 : index
      %40 = vector.load %arg6[%c0_22, %c0_23] : memref<1x128xf32, #tpu.memory_space<vmem>>, vector<1x128xf32>
      %41 = vector.broadcast %40 : vector<1x128xf32> to vector<32x128xf32>
      %42 = arith.addf %39, %41 : vector<32x128xf32>
      %c0_24 = arith.constant 0 : index
      %c0_25 = arith.constant 0 : index
      %43 = vector.load %arg7[%c0_24, %c0_25] : memref<32x128xf32, #tpu.memory_space<vmem>>, vector<32x128xf32>
      tpu.vector_store %arg7[%c0_24, %c0_25], %42 {strides = array<i32>} : memref<32x128xf32, #tpu.memory_space<vmem>>, vector<32x128xf32>,
    } else {
    }
    return
  }
  func.func @transform_0(%arg0: i32, %arg1: i32) -> (i32, i32) {
    %c0_i32 = arith.constant 0 : i32
    return %arg0, %arg1 : i32, i32
  }
  func.func @transform_1(%arg0: i32, %arg1: i32) -> (i32, i32) {
    %c0_i32 = arith.constant 0 : i32
    %c0_i32_0 = arith.constant 0 : i32
    return %arg1, %c0_i32 : i32, i32
  }
  func.func @transform_2(%arg0: i32, %arg1: i32) -> (i32, i32) {
    %c0_i32 = arith.constant 0 : i32
    %c0_i32_0 = arith.constant 0 : i32
    %c0_i32_1 = arith.constant 0 : i32
    return %c0_i32, %c0_i32_0 : i32, i32
  }
  func.func @transform_3(%arg0: i32, %arg1: i32) -> (i32, i32) {
    %c0_i32 = arith.constant 0 : i32
    %c0_i32_0 = arith.constant 0 : i32
    %c0_i32_1 = arith.constant 0 : i32
    return %c0_i32, %c0_i32_0 : i32, i32
  }
  func.func @transform_4(%arg0: i32, %arg1: i32) -> (i32, i32) {
    %c0_i32 = arith.constant 0 : i32
    %c0_i32_0 = arith.constant 0 : i32
    %c0_i32_1 = arith.constant 0 : i32
    return %c0_i32, %c0_i32_0 : i32, i32
  }
  func.func @transform_5(%arg0: i32, %arg1: i32) -> (i32, i32) {
    %c0_i32 = arith.constant 0 : i32
    %c0_i32_0 = arith.constant 0 : i32
    return %arg0, %c0_i32 : i32, i32
  }
}

</mosaic_0001>

<bundles_post_ra>
// kernel: tpu_custom_call.1
= control target key start
LH: loop header
LB: loop body
LE: loop exit
PB: predicated region body
PF: predicated region fallthrough
CT: control target
= control target key end

     0   :  { %10 = vsyncpa [#allocation4], 0  ;;  %s543_s0 = inlined_call_operand.hbm [shape: f32[32,128], index: 0, kind: input, shape index: {}]   ;;  %s544_s1 = inlined_call_operand.hbm [shape: bf16[128,128], index: 1, kind: input, shape index: {}]   ;;  %s545_s2 = inlined_call_operand.vmem [shape: f32[1,128], index: 2, kind: input, shape index: {}]   ;;  %s546_s3 = inlined_call_operand.vmem [shape: f32[1,128], index: 3, kind: input, shape index: {}]   ;;  %s547_s4 = inlined_call_operand.vmem [shape: f32[1,128], index: 4, kind: input, shape index: {}]   ;;  %s548_s5 = inlined_call_operand.hbm [shape: f32[32,128], index: 5, kind: output, shape index: {}]  }
   0x1   :  { %11 = vsyncpa [#allocation7], 0 }
   0x2   :  { %12 = vsyncpa [#allocation5], 0  ;;  %s443_s18 = smov [#allocation3]   ;;  %s371_s22 = scalar_lea.hbm %s543_s0, 512 }
   0x3   :  { %s18_s19 = sshll.u32 %s443_s18, 4  ;;  %p372_p0 = scmp.ne.s32.totalorder %s543_s0, %s371_s22  ;;  %s19_s19 = int_to_ptr.vmem [resolvable:$true] %s18_s19 }
   0x4   :  { %p375_p1 = scmp.lt.u32.totalorder %s371_s22, %s543_s0 }
   0x6   :  { %p377_p2 = pnand %p375_p1, %p372_p0 }
   0x8   :  { %380 = shalt.err (!%p377_p2)
}
   0x9   :  { %s381_s27 = scalar_lea.vmem %s19_s19, 512  ;;  %p386_p4 = scmp.lt.s32.totalorder %s19_s19, %s19_s19 }
   0xa   :  { %p382_p3 = scmp.ne.s32.totalorder %s19_s19, %s381_s27  ;;  %p387_p5 = scmp.lt.s32.totalorder %s381_s27, %s381_s27 }
   0xc   :  { %p388_p6 = por %p387_p5, %p386_p4 }
   0xe   :  { %p389_p7 = pnand %p388_p6, %p382_p3 }
  0x10   :  { %392 = shalt.err (!%p389_p7)
}
  0x11   :  { %s444_s28 = smov 128   ;;  %s445_s29 = smov 8  }
  0x12   :  { %24 = dma.hbm_to_vmem [thread:$0]  %s543_s0, 512, %s19_s19, [#allocation4], %s444_s28, %s444_s28, %s445_s29  }
  0x13   :  { %s446_s7 = smov [#allocation6]   ;;  %s393_s11 = scalar_lea.hbm %s544_s1, 1024 }
  0x14   :  { %s30_s8 = sshll.u32 %s446_s7, 4  ;;  %p394_p8 = scmp.ne.s32.totalorder %s544_s1, %s393_s11  ;;  %s31_s8 = int_to_ptr.vmem [resolvable:$true] %s30_s8 }
  0x15   :  { %p397_p9 = scmp.lt.u32.totalorder %s393_s11, %s544_s1 }
  0x17   :  { %p399_p10 = pnand %p397_p9, %p394_p8 }
  0x19   :  { %402 = shalt.err (!%p399_p10)
}
  0x1a   :  { %s403_s16 = scalar_lea.vmem %s31_s8, 1024  ;;  %p408_p12 = scmp.lt.s32.totalorder %s31_s8, %s31_s8 }
  0x1b   :  { %p404_p11 = scmp.ne.s32.totalorder %s31_s8, %s403_s16  ;;  %p409_p13 = scmp.lt.s32.totalorder %s403_s16, %s403_s16 }
  0x1d   :  { %p410_p0 = por %p409_p13, %p408_p12 }
  0x1f   :  { %p411_p1 = pnand %p410_p0, %p404_p11 }
  0x21   :  { %414 = shalt.err (!%p411_p1)
}
  0x22   :  { %s447_s0 = smov 64   ;;  %s448_s17 = smov 4  }
  0x23   :  { %36 = dma.hbm_to_vmem [thread:$0]  %s544_s1, 1024, %s31_s8, [#allocation7], %s447_s0, %s447_s0, %s448_s17  }
  0x24   :  { %437 = dma.done.wait [#allocation4], 512  }
  0x25   :  { %438 = vsyncadd [#allocation4], 4294966784 }
  0x26   :  { %439 = dma.done.wait [#allocation7], 1024  }
  0x27   :  { %440 = vsyncadd [#allocation7], 4294966272  ;;  %v355_v0 = vld [vmem:[#allocation6] sm:$0xff]   ;;  %v356_v1 = vld [vmem:[#allocation6 + $0x8] sm:$0xff]  }
  0x28   :  { %328 = vmatprep.subr.bf16.mxu0 %v355_v0  ;;  %v357_v2 = vld [vmem:[#allocation6 + $0x10] sm:$0xff]   ;;  %v358_v3 = vld [vmem:[#allocation6 + $0x18] sm:$0xff]   ;;  %v62_v4 = vld [vmem:[#allocation3] sm:$0xff] }
  0x29   :  { %329 = vmatpush3.bf16.msra.mxu0 %v355_v0  ;;  %v63_v5 = vld [vmem:[#allocation3 + $0x8] sm:$0xff]  ;;  %v359_v7 = vld [vmem:[#allocation6 + $0x20] sm:$0xff]   ;;  %v361_v9 = vld [vmem:[#allocation6 + $0x30] sm:$0xff]  }
  0x2a   :  { %330 = vmatprep.subr.bf16.mxu0 %v356_v1  ;;  %v66_v6 = vpack.c.bf16 %v63_v5, %v62_v4  ;;  %v360_v8 = vld [vmem:[#allocation6 + $0x28] sm:$0xff]   ;;  %v362_v10 = vld [vmem:[#allocation6 + $0x38] sm:$0xff]   ;;  %v64_v11 = vld [vmem:[#allocation3 + $0x10] sm:$0xff] }
  0x2b   :  { %v65_v12 = vld [vmem:[#allocation3 + $0x18] sm:$0xff]  ;;  %v315_v14 = vld [vmem:[%s545_s2] ss:$0 sm:$0xff] }
  0x2c   :  { %344 = vmatprep.mubr.bf16.mxu0 %v66_v6  ;;  %v67_v13 = vpack.c.bf16 %v65_v12, %v64_v11  ;;  %v316_v62 = vld [vmem:[%s546_s3] ss:$0 sm:$0xff]  ;;  %s449_s3 = smov [#allocation8]  }
  0x2d   :  { %331 = vmatpush3.bf16.msra.mxu0 %v356_v1  ;;  %s294_s24 = sshll.u32 %s449_s3, 4  ;;  %s295_s24 = int_to_ptr.vmem [resolvable:$true] %s294_s24 }
  0x2e   :  { %332 = vmatprep.subr.bf16.mxu0 %v357_v2  ;;  %p420_p3 = scmp.lt.s32.totalorder %s295_s24, %s295_s24 }
  0x31   :  { %333 = vmatpush3.bf16.msra.mxu0 %v357_v2  ;;  %v317_v2 = vld [vmem:[%s547_s4] ss:$0 sm:$0xff]  ;;  %s415_s4 = scalar_lea.vmem %s295_s24, 512 }
  0x32   :  { %334 = vmatprep.subr.bf16.mxu0 %v358_v3  ;;  %p416_p2 = scmp.ne.s32.totalorder %s295_s24, %s415_s4  ;;  %p421_p4 = scmp.lt.s32.totalorder %s415_s4, %s415_s4 }
  0x34   :  { %p422_p5 = por %p421_p4, %p420_p3 }
  0x35   :  { %335 = vmatpush3.bf16.msra.mxu0 %v358_v3 }
  0x36   :  { %336 = vmatprep.subr.bf16.mxu0 %v359_v7  ;;  %p423_p6 = pnand %p422_p5, %p416_p2 }
  0x39   :  { %337 = vmatpush3.bf16.msra.mxu0 %v359_v7 }
  0x3a   :  { %338 = vmatprep.subr.bf16.mxu0 %v360_v8 }
  0x3d   :  { %339 = vmatpush3.bf16.msra.mxu0 %v360_v8 }
  0x3e   :  { %340 = vmatprep.subr.bf16.mxu0 %v361_v9 }
  0x41   :  { %341 = vmatpush3.bf16.msra.mxu0 %v361_v9 }
  0x42   :  { %342 = vmatprep.subr.bf16.mxu0 %v362_v10 }
  0x45   :  { %343 = vmatpush3.bf16.msra.mxu0 %v362_v10 }
  0x48   :  { %345 = vmatmul.mubr.bf16.vlgmr.msra.gmra.mrb[0].mxu0 %v67_v13 }
 0x11b   :  { %v346_v15 = vpop.f32.mrb[0].mxu0 }
 0x11c   :  { %v510_v16 = vadd.f32 %v346_v15, %v315_v14  ;;  %v166_v17 = vpop.f32.mrb[1].mxu0 }
 0x11d   :  { %v203_v18 = vadd.f32 %v315_v14, %v166_v17  ;;  %v347_v19 = vpop.f32.mrb[2].mxu0 }
 0x11e   :  { %211 = vadd.xlane.f32.xlu1 %v510_v16  ;;  %v169_v20 = vpop.f32.mrb[3].mxu0  ;;  %v513_v21 = vadd.f32 %v347_v19, %v315_v14  ;;  %v221_v26 = vmul.f32 %v510_v16, %v510_v16 }
 0x11f   :  { %207 = vadd.xlane.f32.xlu0 %v203_v18  ;;  %v204_v22 = vadd.f32 %v315_v14, %v169_v20  ;;  %v219_v24 = vmul.f32 %v203_v18, %v203_v18 }
 0x120   :  { %v222_v25 = vmul.f32 %v513_v21, %v513_v21 }
 0x121   :  { %v220_v23 = vmul.f32 %v204_v22, %v204_v22 }
 0x122   :  { %213 = vadd.xlane.f32.xlu1 %v513_v21 }
 0x123   :  { %209 = vadd.xlane.f32.xlu0 %v204_v22 }
 0x126   :  { %225 = vadd.xlane.f32.xlu1 %v220_v23 }
 0x127   :  { %223 = vadd.xlane.f32.xlu0 %v219_v24 }
 0x12a   :  { %229 = vadd.xlane.f32.xlu1 %v222_v25 }
 0x12b   :  { %227 = vadd.xlane.f32.xlu0 %v221_v26 }
 0x1ab   :  { %v212_v27 = vpop.xlane.xlu1 %211 }
 0x1ac   :  { %v208_v28 = vpop.xlane.xlu0 %207  ;;  %v217_v38 = vmul.f32 0.03125, %v212_v27 }
 0x1ad   :  { %v215_v31 = vmul.f32 0.03125, %v208_v28 }
 0x1ae   :  { %v237_v48 = vmul.f32 %v217_v38, %v217_v38  ;;  %v249_v6 = vsub.f32 %v510_v16, %v217_v38 }
 0x1af   :  { %v214_v29 = vpop.xlane.xlu1 %213  ;;  %v235_v39 = vmul.f32 %v215_v31, %v215_v31  ;;  %v247_v61 = vsub.f32 %v203_v18, %v215_v31 }
 0x1b0   :  { %v210_v30 = vpop.xlane.xlu0 %209  ;;  %v218_v35 = vmul.f32 0.03125, %v214_v29 }
 0x1b1   :  { %v216_v32 = vmul.f32 0.03125, %v210_v30 }
 0x1b2   :  { %v238_v44 = vmul.f32 %v218_v35, %v218_v35  ;;  %v250_v3 = vsub.f32 %v513_v21, %v218_v35 }
 0x1b3   :  { %v236_v33 = vmul.f32 %v216_v32, %v216_v32  ;;  %v226_v34 = vpop.xlane.xlu1 %225  ;;  %v248_v59 = vsub.f32 %v204_v22, %v216_v32 }
 0x1b4   :  { %v232_v36 = vmul.f32 0.03125, %v226_v34  ;;  %v224_v37 = vpop.xlane.xlu0 %223 }
 0x1b5   :  { %v231_v40 = vmul.f32 0.03125, %v224_v37 }
 0x1b6   :  { %v240_v41 = vsub.f32 %v232_v36, %v236_v33 }
 0x1b7   :  { %v239_v42 = vsub.f32 %v231_v40, %v235_v39  ;;  %v230_v43 = vpop.xlane.xlu1 %229 }
 0x1b8   :  { %v244_v45 = vmax.f32 %v240_v41, 0.0  ;;  %v234_v46 = vmul.f32 0.03125, %v230_v43  ;;  %v228_v47 = vpop.xlane.xlu0 %227 }
 0x1b9   :  { %v243_v49 = vmax.f32 %v239_v42, 0.0  ;;  %v233_v50 = vmul.f32 0.03125, %v228_v47 }
 0x1ba   :  { %v252_v51 = vadd.f32 1e-05, %v244_v45  ;;  %v242_v52 = vsub.f32 %v234_v46, %v238_v44 }
 0x1bb   :  { %v251_v53 = vadd.f32 1e-05, %v243_v49  ;;  %v241_v54 = vsub.f32 %v233_v50, %v237_v48 }
 0x1bc   :  { %363 = vrsqrt.f32 %v252_v51  ;;  %v246_v55 = vmax.f32 %v242_v52, 0.0 }
 0x1bd   :  { %365 = vrsqrt.f32 %v251_v53  ;;  %v245_v56 = vmax.f32 %v241_v54, 0.0 }
 0x1be   :  { %v254_v57 = vadd.f32 1e-05, %v246_v55 }
 0x1bf   :  { %v253_v58 = vadd.f32 1e-05, %v245_v56 }
 0x1c0   :  { %367 = vrsqrt.f32 %v254_v57 }
 0x1c1   :  { %369 = vrsqrt.f32 %v253_v58 }
 0x1c6   :  { %v364_v60 = vpop.eup %363 }
 0x1c7   :  { %v366_v63 = vpop.eup %365  ;;  %v260_v0 = vmul.f32 %v364_v60, %v248_v59 }
 0x1c8   :  { %v259_v1 = vmul.f32 %v366_v63, %v247_v61 }
 0x1c9   :  { %v271_v4 = vmul.f32 %v316_v62, %v260_v0 }
 0x1ca   :  { %v368_v5 = vpop.eup %367  ;;  %v270_v7 = vmul.f32 %v316_v62, %v259_v1 }
 0x1cb   :  { %v370_v8 = vpop.eup %369  ;;  %v262_v9 = vmul.f32 %v368_v5, %v250_v3  ;;  %v282_v10 = vadd.f32 %v317_v2, %v271_v4 }
 0x1cc   :  { %v261_v11 = vmul.f32 %v370_v8, %v249_v6  ;;  %v281_v12 = vadd.f32 %v317_v2, %v270_v7 }
 0x1cd   :  { %v273_v13 = vmul.f32 %v316_v62, %v262_v9  ;;  %286 = vst [vmem:[#allocation8 + $0x8] sm:$0xff] %v282_v10 }
 0x1ce   :  { %v272_v14 = vmul.f32 %v316_v62, %v261_v11  ;;  %285 = vst [vmem:[#allocation8] sm:$0xff] %v281_v12 }
 0x1cf   :  { %v284_v15 = vadd.f32 %v317_v2, %v273_v13 }
 0x1d0   :  { %v283_v17 = vadd.f32 %v317_v2, %v272_v14 }
 0x1d1   :  { %288 = vst [vmem:[#allocation8 + $0x18] sm:$0xff] %v284_v15 }
 0x1d2   :  { %287 = vst [vmem:[#allocation8 + $0x10] sm:$0xff] %v283_v17 }
 0x1d3   :  { %426 = shalt.err (!%p423_p6)
}
 0x1d4   :  { %s427_s27 = scalar_lea.hbm %s548_s5, 512 }
 0x1d5   :  { %p428_p7 = scmp.ne.s32.totalorder %s548_s5, %s427_s27  ;;  %p431_p8 = scmp.lt.u32.totalorder %s427_s27, %s548_s5 }
 0x1d7   :  { %p433_p9 = pnand %p431_p8, %p428_p7 }
 0x1d9   :  { %436 = shalt.err (!%p433_p9)
}
 0x1da   :  { %300 = dma.vmem_to_hbm [thread:$0]  %s295_s24, 512, %s548_s5, [#allocation5], %s444_s28, %s444_s28, %s445_s29  }
 0x1db   :  { %441 = dma.done.wait [#allocation5], 512  }
 0x1dc   :  { %442 = vsyncadd [#allocation5], 4294966784 }
 0x1dd   :  { %304 = vsyncpa [#allocation4], 1 }
 0x1de   :  { %305 = vsyncpa [#allocation7], 1 }
 0x1df   :  { %306 = vsyncpa [#allocation5], 1 }

</bundles_post_ra>
